<compile_context>
chip_gen: v6e
topology: v6e:2x2x1
jax: 0.10.0
libtpu: 0.0.40
codegen_flags: <defaults>
</compile_context>

<pallas_src>
import math

import jax
import jax.numpy as jnp
from jax.experimental import pallas as pl
from jax.experimental.pallas import tpu as pltpu


def _attention_kernel(hb_ref, e_ref, we_ref, v_ref, o_ref):
    # hb_ref: [Bt, H]     f32            hidden @ Wh^T + bias (hoisted; tiny)
    # e_ref : [T, Bt, H]  f32/bf16/fp8   encoder block in its NATIVE seq-major layout
    # we_ref: [H, H]      f32/bf16/fp8   (W[:, H:]).T, resident across grid steps
    # v_ref : [1, H]      f32            scoring vector
    # o_ref : [Bt, T]     f32            softmax attention weights
    t, bt, h = e_ref.shape
    cd = we_ref.dtype

    # One big-M MXU matmul for the whole batch tile: [(T*Bt), H] @ [H, H] -> f32 acc.
    # Bt is a multiple of 8 sublanes, so the flatten is a layout-preserving shape cast.
    e2 = e_ref[...].reshape(t * bt, h)
    if e2.dtype != cd:
        e2 = e2.astype(cd)   # in-VMEM cast only; HBM bytes were already paid in e's dtype
    energy = jnp.dot(e2, we_ref[...], preferred_element_type=jnp.float32)

    # Add the hoisted hidden projection (broadcast over time) and ReLU, all in f32
    # (keeps the VPU path v5e-friendly).  Reshape back is the same trivial shape cast.
    energy = energy.reshape(t, bt, h) + hb_ref[...][None, :, :]
    energy = jnp.maximum(energy, 0.0)

    # scores[t, b] = sum_h energy[t, b, h] * v[h]   (lane-axis reduction on the XLU).
    scores_tb = jnp.sum(energy * v_ref[...], axis=-1)              # [T, Bt]

    # Small [T, Bt] -> [Bt, T] transpose so time sits on the lane axis for the softmax
    # and the store; only T*Bt elements (negligible next to the matmul).
    scores = scores_tb.T                                            # [Bt, T]

    # Numerically-stable softmax over time; reciprocal on the EUP.  Weights sum to 1
    # within ~1e-2 because of approx=True; switch to approx=False if downstream code
    # needs exact normalization (cost is negligible at this size).
    m = jnp.max(scores, axis=-1, keepdims=True)
    p = jnp.exp(scores - m)
    o_ref[...] = p * pl.reciprocal(jnp.sum(p, axis=-1, keepdims=True), approx=True)


def _default_batch_tile(B, T, H, enc_bytes, wgt_bytes, vmem_budget):
    """Batch tile (rows per grid step) from an explicit VMEM budget.

    Per-step working set ~ 2*Bt*T*H*enc_bytes   (double-buffered encoder DMA block)
                         + 2*Bt*T*H*4           (f32 energy + one elementwise temp)
                         + 2*H*H*wgt_bytes      (We^T, worst-case double-buffered)
    Targets 1024-2048 MXU rows per step (>=512 rows needed to approach the HBM
    roofline) while keeping >=2 "parallel" grid steps so both v7x TensorCores get work
    and step i+1 can be prefetched during step i.
    """
    if B <= 8:
        # No second 8-sublane-aligned tile exists below B=16: grid=(1,) is forced
        # (only happens for tiny problems).
        return 8
    per_row = 2 * H * enc_bytes + 2 * H * 4
    fixed = 2 * H * H * wgt_bytes + 8 * H * 4
    avail = max(vmem_budget - fixed, 8 * T * per_row)
    bt_budget = (avail // (T * per_row)) // 8 * 8
    bt_rows = (max(2048 // T, 8) // 8) * 8          # ~1024-2048 matmul rows per step
    bt_par = max(((B // 2) // 8) * 8, 8)            # keep >=2 grid steps (megacore)
    bt_cap = (B // 8) * 8
    return int(max(8, min(bt_budget, bt_rows, bt_par, bt_cap)))


def attention_forward(hidden, encoder_outputs, attn_weight, attn_bias, v, *,
                      compute_dtype=jnp.bfloat16, batch_tile=None,
                      vmem_limit_bytes=None):
    """Additive-attention forward.

    hidden:          [B, H]
    encoder_outputs: [T, B, H]   native PyTorch seq-major layout (NOT relaid out here)
    attn_weight:     [H, 2H], attn_bias: [H], v: [H]
    Returns float32 attention weights of shape [B, 1, T].

    compute_dtype sets the MXU input dtype of the encoder/We^T matmul (bf16 is the
    right default on v5e/v6e/v7x; f32 reproduces the PyTorch module exactly; an fp8
    dtype is a v7x-only opt-in).  To actually halve HBM traffic, pass encoder_outputs
    already cast to compute_dtype (fuse the cast into its producer); an f32 encoder is
    cast in-VMEM inside the kernel (MXU-rate win, no byte saving).
    """
    T, B, H = encoder_outputs.shape
    f32 = jnp.float32

    # Linear(cat(h, e)) = h @ Wh^T + e @ We^T + bias with Wh = W[:, :H], We = W[:, H:].
    # Hoist the tiny hidden-side projection; Wh never occupies VMEM.
    wh_t = jnp.transpose(attn_weight[:, :H]).astype(f32)
    we_t = jnp.transpose(attn_weight[:, H:]).astype(compute_dtype)        # [H, H]
    hb = hidden.astype(f32) @ wh_t + attn_bias.astype(f32)[None, :]       # [B, H]
    v_row = v.reshape(1, H).astype(f32)

    # Per-generation VMEM cap (v7x: 64 MiB physical -> ~48 MiB; v5e/v6e: up to ~96 MiB).
    if vmem_limit_bytes is None:
        try:
            phys = int(pltpu.get_tpu_info().vmem_capacity_bytes)
        except Exception:
            phys = 64 * 1024 * 1024                      # v7x-safe fallback
        vmem_limit_bytes = max(32 * 1024 * 1024,
                               min(phys * 3 // 4, 100 * 1024 * 1024))
    vmem_limit_bytes = int(vmem_limit_bytes)

    enc_bytes = jnp.dtype(encoder_outputs.dtype).itemsize
    wgt_bytes = jnp.dtype(compute_dtype).itemsize
    if batch_tile is None:
        Bt = _default_batch_tile(B, T, H, enc_bytes, wgt_bytes,
                                 (vmem_limit_bytes * 7) // 10)
    else:
        Bt = max(8, (int(batch_tile) // 8) * 8)
    Bt = int(min(Bt, max(8, pl.cdiv(B, 8) * 8)))   # at most one tile of batch padding

    # Tiny batches (< 8) are padded up to one 8-sublane tile so the in-kernel flatten
    # stays layout-preserving; larger batches are never padded (Pallas handles the
    # ragged final block: garbage rows are computed row-independently and their writes
    # are dropped).
    enc = encoder_outputs
    if B < Bt:
        enc = jnp.pad(enc, ((0, 0), (0, Bt - B), (0, 0)))
    Bk = max(B, Bt)
    num_blocks = int(pl.cdiv(Bk, Bt))
    if num_blocks * Bt != B:
        hb = jnp.pad(hb, ((0, num_blocks * Bt - B), (0, 0)))   # tiny; makes reads defined

    # Single-buffer the resident (constant-index) weight tile when it is large enough
    # to matter: it is never re-fetched, and default double-buffering would waste an
    # extra H*H*itemsize of VMEM against v7x's 64 MiB ceiling.
    if H >= 1024:
        we_spec = pl.BlockSpec((H, H), lambda i: (0, 0), pipeline_mode=pl.Buffered(1))
    else:
        we_spec = pl.BlockSpec((H, H), lambda i: (0, 0))
    # TODO(synk): for H >~ 2048 add a K/N-tiled contraction grid axis with an f32 VMEM
    # accumulator (init/finalize via pl.when) so the resident H x H We^T tile stays
    # within v7x's 64 MiB VMEM without shrinking the MXU-efficient M dimension.

    out = pl.pallas_call(
        _attention_kernel,
        out_shape=jax.ShapeDtypeStruct((Bk, T), f32),
        grid=(num_blocks,),
        in_specs=[
            pl.BlockSpec((Bt, H), lambda i: (i, 0)),          # hb        [Bt, H]
            pl.BlockSpec((T, Bt, H), lambda i: (0, i, 0)),    # encoder   [T, Bt, H]
            we_spec,                                           # We^T      (resident)
            pl.BlockSpec((1, H), lambda i: (0, 0)),           # v         (resident)
        ],
        out_specs=pl.BlockSpec((Bt, T), lambda i: (i, 0)),
        compiler_params=pltpu.CompilerParams(
            dimension_semantics=("parallel",),
            vmem_limit_bytes=vmem_limit_bytes,
        ),
    )(hb, enc, we_t, v_row)

    return out[:B].reshape(B, 1, T)


def attention_reference(hidden, encoder_outputs, attn_weight, attn_bias, v):
    """Pure-JAX reference matching the PyTorch forward exactly (f32)."""
    T, B, H = encoder_outputs.shape
    h = jnp.broadcast_to(hidden[None, :, :], (T, B, H)).transpose(1, 0, 2)   # [B,T,H]
    e = encoder_outputs.transpose(1, 0, 2)                                   # [B,T,H]
    cat = jnp.concatenate([h, e], axis=2)                                    # [B,T,2H]
    energy = jax.nn.relu(jnp.einsum("bti,oi->bto", cat, attn_weight) + attn_bias)
    scores = jnp.einsum("bth,h->bt", energy, v)                              # [B,T]
    return jax.nn.softmax(scores, axis=1)[:, None, :]                        # [B,1,T]


if __name__ == "__main__":
    keys = jax.random.split(jax.random.PRNGKey(0), 10)

    # ---- Small shapes implied by the module ------------------------------------
    B, T, H = 2, 8, 32
    bound = 1.0 / math.sqrt(2 * H)   # nn.Linear(2H, H) default init bound
    attn_weight = jax.random.uniform(keys[0], (H, 2 * H), jnp.float32, -bound, bound)
    attn_bias = jax.random.uniform(keys[1], (H,), jnp.float32, -bound, bound)
    v = jax.random.normal(keys[2], (H,), jnp.float32) * (1.0 / math.sqrt(H))
    hidden = jax.random.normal(keys[3], (B, H), jnp.float32)
    encoder_outputs = jax.random.normal(keys[4], (T, B, H), jnp.float32)

    ref = attention_reference(hidden, encoder_outputs, attn_weight, attn_bias, v)

    # f32 path: exact module numerics (approx reciprocal -> slightly relaxed tol).
    out = attention_forward(hidden, encoder_outputs, attn_weight, attn_bias, v,
                            compute_dtype=jnp.float32)
    out = jax.block_until_ready(out)
    assert out.shape == (B, 1, T), out.shape
    assert jnp.allclose(out, ref, atol=5e-3, rtol=5e-3)
    assert jnp.allclose(jnp.sum(out, axis=-1), 1.0, atol=1e-2)

    # bf16 MXU-input path with an f32 encoder stream (cast happens in-VMEM).
    out_bf16 = attention_forward(hidden, encoder_outputs, attn_weight, attn_bias, v,
                                 compute_dtype=jnp.bfloat16)
    out_bf16 = jax.block_until_ready(out_bf16)
    assert out_bf16.shape == (B, 1, T), out_bf16.shape
    assert jnp.allclose(out_bf16, ref, atol=3e-2, rtol=3e-2)

    # ---- Larger, tiled shape: >=2 "parallel" grid steps, 8-aligned batch tiles,
    # lane-aligned T=128 softmax, and a producer-fused bf16 encoder stream ---------
    B2, T2, H2 = 32, 128, 128
    bound2 = 1.0 / math.sqrt(2 * H2)
    w2 = jax.random.uniform(keys[5], (H2, 2 * H2), jnp.float32, -bound2, bound2)
    b2 = jax.random.uniform(keys[6], (H2,), jnp.float32, -bound2, bound2)
    v2 = jax.random.normal(keys[7], (H2,), jnp.float32) * (1.0 / math.sqrt(H2))
    hidden2 = jax.random.normal(keys[8], (B2, H2), jnp.float32)
    enc2 = jax.random.normal(keys[9], (T2, B2, H2), jnp.float32)

    ref2 = attention_reference(hidden2, enc2, w2, b2, v2)
    out2 = attention_forward(hidden2, enc2.astype(jnp.bfloat16), w2, b2, v2,
                             compute_dtype=jnp.bfloat16)
    out2 = jax.block_until_ready(out2)
    assert out2.shape == (B2, 1, T2), out2.shape
    assert jnp.allclose(out2, ref2, atol=3e-2, rtol=3e-2)
    assert jnp.allclose(jnp.sum(out2, axis=-1), 1.0, atol=1e-2)

    print("KERNEL_OK")
</pallas_src>

<mosaic_0001>
module attributes {stable_mosaic.version = 11 : i64} {
  func.func @_attention_kernel(%arg0: i32, %arg1: memref<8x32xf32, #tpu.memory_space<vmem>>, %arg2: memref<8x8x32xf32, #tpu.memory_space<vmem>>, %arg3: memref<32x32xf32, #tpu.memory_space<vmem>>, %arg4: memref<1x32xf32, #tpu.memory_space<vmem>>, %arg5: memref<8x8xf32, #tpu.memory_space<vmem>>) attributes {dimension_semantics = [#tpu.dimension_semantics<parallel>], iteration_bounds = array<i64: 1>, scalar_prefetch = 0 : i64, scratch_operands = 0 : i64, tpu.core_type = #tpu.core_type<tc>, window_params = [{transform_indices = @transform_0, window_bounds = array<i64: 8, 32>}, {transform_indices = @transform_1, window_bounds = array<i64: 8, 8, 32>}, {pipeline_mode = #tpu.pipeline_mode<synchronous>, transform_indices = @transform_2, window_bounds = array<i64: 32, 32>}, {pipeline_mode = #tpu.pipeline_mode<synchronous>, transform_indices = @transform_3, window_bounds = array<i64: 1, 32>}, {transform_indices = @transform_4, window_bounds = array<i64: 8, 8>}]} {
    %c0 = arith.constant 0 : index
    %c0_0 = arith.constant 0 : index
    %c0_1 = arith.constant 0 : index
    %0 = vector.load %arg2[%c0, %c0_0, %c0_1] : memref<8x8x32xf32, #tpu.memory_space<vmem>>, vector<8x8x32xf32>
    %1 = vector.shape_cast %0 : vector<8x8x32xf32> to vector<64x32xf32>
    %c0_2 = arith.constant 0 : index
    %c0_3 = arith.constant 0 : index
    %2 = vector.load %arg3[%c0_2, %c0_3] : memref<32x32xf32, #tpu.memory_space<vmem>>, vector<32x32xf32>
    %cst = arith.constant dense<0.000000e+00> : vector<64x32xf32>
    %3 = tpu.matmul %1, %2, %cst {dimension_numbers = #tpu.dot_dimension_numbers<[1], [0], [0], [1], [0, 0, 1, 1], [], []>} : vector<64x32xf32>, vector<32x32xf32>, vector<64x32xf32> -> vector<64x32xf32>
    %4 = vector.shape_cast %3 : vector<64x32xf32> to vector<8x8x32xf32>
    %c0_4 = arith.constant 0 : index
    %c0_5 = arith.constant 0 : index
    %5 = vector.load %arg1[%c0_4, %c0_5] : memref<8x32xf32, #tpu.memory_space<vmem>>, vector<8x32xf32>
    %6 = vector.shape_cast %5 : vector<8x32xf32> to vector<1x8x32xf32>
    %7 = vector.broadcast %6 : vector<1x8x32xf32> to vector<8x8x32xf32>
    %8 = arith.addf %4, %7 : vector<8x8x32xf32>
    %cst_6 = arith.constant 0.000000e+00 : f32
    %9 = vector.broadcast %cst_6 : f32 to vector<8x8x32xf32>
    %10 = arith.maximumf %8, %9 : vector<8x8x32xf32>
    %c0_7 = arith.constant 0 : index
    %c0_8 = arith.constant 0 : index
    %11 = vector.load %arg4[%c0_7, %c0_8] : memref<1x32xf32, #tpu.memory_space<vmem>>, vector<1x32xf32>
    %12 = vector.shape_cast %11 : vector<1x32xf32> to vector<1x1x32xf32>
    %13 = vector.broadcast %12 : vector<1x1x32xf32> to vector<8x8x32xf32>
    %14 = arith.mulf %10, %13 : vector<8x8x32xf32>
    %cst_9 = arith.constant dense<0.000000e+00> : vector<8x8xf32>
    %15 = vector.multi_reduction <add>, %14, %cst_9 [2] : vector<8x8x32xf32> to vector<8x8xf32>
    %16 = tpu.transpose %15, [1, 0] : vector<8x8xf32> -> vector<8x8xf32>
    %cst_10 = arith.constant dense<0xFF800000> : vector<8xf32>
    %17 = vector.multi_reduction <maximumf>, %16, %cst_10 [1] : vector<8x8xf32> to vector<8xf32>
    %18 = vector.shape_cast %17 : vector<8xf32> to vector<8x1xf32>
    %19 = vector.broadcast %18 : vector<8x1xf32> to vector<8x8xf32>
    %20 = arith.subf %16, %19 : vector<8x8xf32>
    %21 = math.exp %20 : vector<8x8xf32>
    %cst_11 = arith.constant dense<0.000000e+00> : vector<8xf32>
    %22 = vector.multi_reduction <add>, %21, %cst_11 [1] : vector<8x8xf32> to vector<8xf32>
    %23 = vector.shape_cast %22 : vector<8xf32> to vector<8x1xf32>
    %24 = tpu.reciprocal %23 {approx = true} : vector<8x1xf32> -> vector<8x1xf32>
    %25 = vector.broadcast %24 : vector<8x1xf32> to vector<8x8xf32>
    %26 = arith.mulf %21, %25 : vector<8x8xf32>
    %c0_12 = arith.constant 0 : index
    %c0_13 = arith.constant 0 : index
    %27 = vector.load %arg5[%c0_12, %c0_13] : memref<8x8xf32, #tpu.memory_space<vmem>>, vector<8x8xf32>
    tpu.vector_store %arg5[%c0_12, %c0_13], %26 {strides = array<i32>} : memref<8x8xf32, #tpu.memory_space<vmem>>, vector<8x8xf32>,
    return
  }
  func.func @transform_0(%arg0: i32) -> (i32, i32) {
    %c0_i32 = arith.constant 0 : i32
    %c0_i32_0 = arith.constant 0 : i32
    return %arg0, %c0_i32 : i32, i32
  }
  func.func @transform_1(%arg0: i32) -> (i32, i32, i32) {
    %c0_i32 = arith.constant 0 : i32
    %c0_i32_0 = arith.constant 0 : i32
    %c0_i32_1 = arith.constant 0 : i32
    return %c0_i32, %arg0, %c0_i32_0 : i32, i32, i32
  }
  func.func @transform_2(%arg0: i32) -> (i32, i32) {
    %c0_i32 = arith.constant 0 : i32
    %c0_i32_0 = arith.constant 0 : i32
    %c0_i32_1 = arith.constant 0 : i32
    return %c0_i32, %c0_i32_0 : i32, i32
  }
  func.func @transform_3(%arg0: i32) -> (i32, i32) {
    %c0_i32 = arith.constant 0 : i32
    %c0_i32_0 = arith.constant 0 : i32
    %c0_i32_1 = arith.constant 0 : i32
    return %c0_i32, %c0_i32_0 : i32, i32
  }
  func.func @transform_4(%arg0: i32) -> (i32, i32) {
    %c0_i32 = arith.constant 0 : i32
    %c0_i32_0 = arith.constant 0 : i32
    return %arg0, %c0_i32 : i32, i32
  }
}

</mosaic_0001>

<bundles_post_ra>
// kernel: tpu_custom_call.1
= control target key start
LH: loop header
LB: loop body
LE: loop exit
PB: predicated region body
PF: predicated region fallthrough
CT: control target
= control target key end

     0   :  { %9 = vsyncpa [#allocation3], 0  ;;  %s584_s0 = inlined_call_operand.hbm [shape: f32[8,32], index: 0, kind: input, shape index: {}]   ;;  %s585_s1 = inlined_call_operand.hbm [shape: f32[8,8,32], index: 1, kind: input, shape index: {}]   ;;  %s586_s2 = inlined_call_operand.hbm [shape: f32[32,32], index: 2, kind: input, shape index: {}]   ;;  %s587_s3 = inlined_call_operand.vmem [shape: f32[1,32], index: 3, kind: input, shape index: {}]   ;;  %s588_s4 = inlined_call_operand.hbm [shape: f32[8,8], index: 4, kind: output, shape index: {}]  }
   0x1   :  { %10 = vsyncpa [#allocation6], 0 }
   0x2   :  { %11 = vsyncpa [#allocation4], 0  ;;  %s519_s15 = smov [#allocation5]  }
   0x3   :  { %s27_s16 = sshll.u32 %s519_s15, 4  ;;  %s28_s16 = int_to_ptr.vmem [resolvable:$true] %s27_s16 }
   0x4   :  { %s441_s17 = scalar_lea.vmem %s28_s16, 1024  ;;  %p446_p1 = scmp.lt.s32.totalorder %s28_s16, %s28_s16 }
   0x5   :  { %p442_p0 = scmp.ne.s32.totalorder %s28_s16, %s441_s17  ;;  %p447_p2 = scmp.lt.s32.totalorder %s441_s17, %s441_s17 }
   0x7   :  { %p448_p3 = por %p447_p2, %p446_p1 }
   0x9   :  { %p449_p4 = pnand %p448_p3, %p442_p0 }
   0xb   :  { %452 = shalt.err (!%p449_p4)
}
   0xc   :  { %s520_s18 = smov 128   ;;  %s521_s19 = smov 8  }
   0xd   :  { %33 = dma.hbm_to_vmem [thread:$0]  %s585_s1, 1024, %s28_s16, [#allocation6], %s520_s18, %s520_s18, %s521_s19  }
   0xe   :  { %s522_s22 = smov [#allocation2]   ;;  %s523_s24 = smov [#allocation7]  }
   0xf   :  { %s18_s23 = sshll.u32 %s522_s22, 4  ;;  %s39_s25 = sshll.u32 %s523_s24, 4  ;;  %s19_s23 = int_to_ptr.vmem [resolvable:$true] %s18_s23  ;;  %s40_s25 = int_to_ptr.vmem [resolvable:$true] %s39_s25 }
  0x10   :  { %s461_s26 = scalar_lea.vmem %s19_s23, 128  ;;  %p466_p6 = scmp.lt.s32.totalorder %s19_s23, %s19_s23 }
  0x11   :  { %p462_p5 = scmp.ne.s32.totalorder %s19_s23, %s461_s26  ;;  %p467_p7 = scmp.lt.s32.totalorder %s461_s26, %s461_s26 }
  0x13   :  { %p468_p8 = por %p467_p7, %p466_p6 }
  0x15   :  { %p469_p9 = pnand %p468_p8, %p462_p5 }
  0x17   :  { %472 = shalt.err (!%p469_p9)
}
  0x18   :  { %21 = dma.hbm_to_vmem [thread:$0]  %s584_s0, 128, %s19_s23, [#allocation3]  }
  0x19   :  { %s481_s29 = scalar_lea.vmem %s40_s25, 512  ;;  %p486_p11 = scmp.lt.s32.totalorder %s40_s25, %s40_s25 }
  0x1a   :  { %p482_p10 = scmp.ne.s32.totalorder %s40_s25, %s481_s29  ;;  %p487_p12 = scmp.lt.s32.totalorder %s481_s29, %s481_s29 }
  0x1c   :  { %p488_p13 = por %p487_p12, %p486_p11 }
  0x1e   :  { %p489_p0 = pnand %p488_p13, %p482_p10 }
  0x20   :  { %492 = shalt.err (!%p489_p0)
}
  0x21   :  { %45 = dma.hbm_to_vmem [thread:$0]  %s586_s2, 512, %s40_s25, [#allocation6], %s520_s18, %s520_s18, %s521_s19  }
  0x22   :  { %513 = dma.done.wait [#allocation3], 128  }
  0x23   :  { %514 = vsyncadd [#allocation3], 4294967168 }
  0x24   :  { %515 = dma.done.wait [#allocation6], 1536  }
  0x25   :  { %516 = vsyncadd [#allocation6], 4294965760  ;;  %vm69_vm0 = vcmask 261120   ;;  %v68_v0 = vld [vmem:[#allocation7 + $0x18] sm:$0xff]  ;;  %v67_v1 = vld [vmem:[#allocation7 + $0x10] sm:$0xff]  ;;  %v263_v54 = vlaneseq  ;;  %vm297_vm1 = vcmask 1041409  }
  0x26   :  { %394 = vmatprep.subr.mxu0 %v68_v0  ;;  %414 = vmatprep.subr.mxu1 %v68_v0  ;;  %v57_v2 = vld [vmem:[#allocation5] sm:$0xff]  ;;  %v66_v3 = vld [vmem:[#allocation7 + $0x8] sm:$0xff]  ;;  %v59_v6 = vld [vmem:[#allocation5 + $0x10] sm:$0xff]  ;;  %vm299_vm2 = vcmask 1042434   ;;  %vm301_vm3 = vcmask 1043459   ;;  %vm303_vm4 = vcmask 1044484  }
  0x27   :  { %395 = vmatpush3.msra.mxu0 %v68_v0  ;;  %402 = vmatprep.mubr.msk.f32.mxu0 %vm69_vm0, %v57_v2  ;;  %v65_v4 = vld [vmem:[#allocation7] sm:$0xff]  ;;  %v58_v5 = vld [vmem:[#allocation5 + $0x8] sm:$0xff]  ;;  %v63_v9 = vld [vmem:[#allocation5 + $0x30] sm:$0xff]  ;;  %v264_v55 = vand.u32 127, %v263_v54  ;;  %v266_v56 = vshrl.u32 %v263_v54, 7  ;;  %vm305_vm5 = vcmask 1045509  }
  0x28   :  { %396 = vmatprep.subr.mxu0 %v67_v1  ;;  %418 = vmatpush3.msra.mxu1 %v68_v0  ;;  %v61_v7 = vld [vmem:[#allocation5 + $0x20] sm:$0xff]  ;;  %v62_v8 = vld [vmem:[#allocation5 + $0x28] sm:$0xff]  ;;  %v60_v10 = vld [vmem:[#allocation5 + $0x18] sm:$0xff]  ;;  %vm307_vm6 = vcmask 1046534   ;;  %vm309_vm7 = vcmask 1047559   ;;  %vm344_vm8 = vcmask 64512  }
  0x29   :  { %397 = vmatpush3.msra.mxu0 %v67_v1  ;;  %415 = vmatprep.subr.mxu1 %v67_v1  ;;  %v64_v11 = vld [vmem:[#allocation5 + $0x38] sm:$0xff]  ;;  %v267_v58 = vsub.s32 %v264_v55, %v266_v56 }
  0x2a   :  { %398 = vmatprep.subr.mxu0 %v66_v3  ;;  %419 = vmatpush3.msra.mxu1 %v67_v1  ;;  %v199_v12 = vld [vmem:[#allocation2] sm:$0xff] }
  0x2b   :  { %399 = vmatpush3.msra.mxu0 %v66_v3  ;;  %416 = vmatprep.subr.mxu1 %v66_v3  ;;  %v381_v17 = vld [vmem:[%s587_s3] ss:$0 sm:$0xff]  ;;  %s524_s3 = smov [#allocation8]  }
  0x2c   :  { %400 = vmatprep.subr.mxu0 %v65_v4  ;;  %420 = vmatpush3.msra.mxu1 %v66_v3  ;;  %s363_s5 = sshll.u32 %s524_s3, 4  ;;  %s364_s5 = int_to_ptr.vmem [resolvable:$true] %s363_s5 }
  0x2d   :  { %401 = vmatpush3.msra.mxu0 %v65_v4  ;;  %417 = vmatprep.subr.mxu1 %v65_v4  ;;  %s493_s6 = scalar_lea.vmem %s364_s5, 128  ;;  %p498_p2 = scmp.lt.s32.totalorder %s364_s5, %s364_s5 }
  0x2e   :  { %403 = vmatmul.mubr.msk.f32.vlgmr.msra.gmra.mxu0 %vm69_vm0, %v58_v5  ;;  %421 = vmatpush3.msra.mxu1 %v65_v4  ;;  %p494_p1 = scmp.ne.s32.totalorder %s364_s5, %s493_s6  ;;  %p499_p3 = scmp.lt.s32.totalorder %s493_s6, %s493_s6 }
  0x2f   :  { %405 = vmatprep.mubr.msk.f32.mxu0 %vm69_vm0, %v59_v6  ;;  %408 = vmatprep.mubr.msk.f32.mxu1 %vm69_vm0, %v61_v7 }
  0x30   :  { %409 = vmatmul.mubr.msk.f32.vlgmr.msra.gmra.mxu1 %vm69_vm0, %v62_v8  ;;  %p500_p4 = por %p499_p3, %p498_p2 }
  0x31   :  { %411 = vmatprep.mubr.msk.f32.mxu1 %vm69_vm0, %v63_v9 }
  0x32   :  { %406 = vmatmul.mubr.msk.f32.gmra.mxu0 %vm69_vm0, %v60_v10  ;;  %p501_p5 = pnand %p500_p4, %p494_p1 }
  0x34   :  { %412 = vmatmul.mubr.msk.f32.gmra.mxu1 %vm69_vm0, %v64_v11 }
  0xee   :  { %v404_v13 = vpop.f32.mrf.mxu0 }
  0xef   :  { %v201_v14 = vadd.f32 %v404_v13, %v199_v12 }
  0xf0   :  { %v160_v15 = vpop.f32.mrf.mxu0  ;;  %v410_v16 = vpop.f32.mrf.mxu1 }
  0xf1   :  { %v209_v18 = vmax.f32 %v201_v14, 0.0  ;;  %v200_v19 = vadd.f32 %v199_v12, %v160_v15  ;;  %v205_v26 = vadd.f32 %v410_v16, %v199_v12 }
  0xf2   :  { %v407_v20 = vpop.f32.mrf.mxu0  ;;  %v180_v21 = vpop.f32.mrf.mxu1 }
  0xf3   :  { %v208_v22 = vmax.f32 %v200_v19, 0.0  ;;  %v203_v23 = vadd.f32 %v407_v20, %v199_v12  ;;  %v224_v24 = vmul.f32 %v381_v17, %v209_v18  ;;  %v204_v27 = vadd.f32 %v199_v12, %v180_v21 }
  0xf4   :  { %v170_v25 = vpop.f32.mrf.mxu0  ;;  %v413_v28 = vpop.f32.mrf.mxu1  ;;  %v213_v38 = vmax.f32 %v205_v26, 0.0 }
  0xf5   :  { %v211_v29 = vmax.f32 %v203_v23, 0.0  ;;  %v202_v30 = vadd.f32 %v199_v12, %v170_v25  ;;  %v234_v31 = vsel %vm69_vm0, %v224_v24, 0.0  ;;  %v212_v32 = vmax.f32 %v204_v27, 0.0 }
  0xf6   :  { %235 = vadd.xlane.f32.xlu0 %v234_v31  ;;  %v223_v33 = vmul.f32 %v381_v17, %v208_v22  ;;  %v190_v34 = vpop.f32.mrf.mxu1  ;;  %v207_v39 = vadd.f32 %v413_v28, %v199_v12  ;;  %v228_v49 = vmul.f32 %v381_v17, %v213_v38 }
  0xf7   :  { %v210_v35 = vmax.f32 %v202_v30, 0.0  ;;  %v226_v36 = vmul.f32 %v381_v17, %v211_v29  ;;  %v206_v37 = vadd.f32 %v199_v12, %v190_v34  ;;  %v227_v40 = vmul.f32 %v381_v17, %v212_v32 }
  0xf8   :  { %v231_v41 = vsel %vm69_vm0, %v223_v33, 0.0  ;;  %v215_v47 = vmax.f32 %v207_v39, 0.0  ;;  %v246_v51 = vsel %vm69_vm0, %v228_v49, 0.0 }
  0xf9   :  { %v240_v42 = vsel %vm69_vm0, %v226_v36, 0.0  ;;  %v214_v43 = vmax.f32 %v206_v37, 0.0  ;;  %v225_v44 = vmul.f32 %v381_v17, %v210_v35  ;;  %v243_v45 = vsel %vm69_vm0, %v227_v40, 0.0 }
  0xfa   :  { %232 = vadd.xlane.f32.xlu0 %v231_v41  ;;  %241 = vadd.xlane.f32.xlu1 %v240_v42  ;;  %v230_v52 = vmul.f32 %v381_v17, %v215_v47 }
  0xfb   :  { %v229_v46 = vmul.f32 %v381_v17, %v214_v43  ;;  %v237_v48 = vsel %vm69_vm0, %v225_v44, 0.0 }
  0xfc   :  { %v252_v53 = vsel %vm69_vm0, %v230_v52, 0.0 }
  0xfd   :  { %v249_v50 = vsel %vm69_vm0, %v229_v46, 0.0 }
  0xfe   :  { %238 = vadd.xlane.f32.xlu1 %v237_v48  ;;  %244 = vadd.xlane.f32.xlu0 %v243_v45 }
 0x102   :  { %247 = vadd.xlane.f32.xlu1 %v246_v51  ;;  %250 = vadd.xlane.f32.xlu0 %v249_v50 }
 0x106   :  { %253 = vadd.xlane.f32.xlu1 %v252_v53 }
 0x17f   :  { %v236_v57 = vpop.xlane.xlu0 %235 }
 0x180   :  { %v272_v62 = vrot.slane %v236_v57, %v267_v58 }
 0x183   :  { %v233_v59 = vpop.xlane.xlu0 %232  ;;  %v242_v60 = vpop.xlane.xlu1 %241 }
 0x184   :  { %v268_v61 = vrot.slane %v233_v59, %v267_v58  ;;  %v280_v4 = vrot.slane %v242_v60, %v267_v58 }
 0x186   :  { %v298_v3 = vsel %vm297_vm1, %v272_v62, %v268_v61 }
 0x187   :  { %v239_v63 = vpop.xlane.xlu1 %238  ;;  %v245_v0 = vpop.xlane.xlu0 %244 }
 0x188   :  { %v276_v1 = vrot.slane %v239_v63, %v267_v58  ;;  %v284_v2 = vrot.slane %v245_v0, %v267_v58 }
 0x18a   :  { %v300_v5 = vsel %vm299_vm2, %v276_v1, %v298_v3 }
 0x18b   :  { %v302_v6 = vsel %vm301_vm3, %v280_v4, %v300_v5  ;;  %v248_v7 = vpop.xlane.xlu1 %247  ;;  %v251_v8 = vpop.xlane.xlu0 %250 }
 0x18c   :  { %v304_v9 = vsel %vm303_vm4, %v284_v2, %v302_v6  ;;  %v288_v10 = vrot.slane %v248_v7, %v267_v58  ;;  %v292_v11 = vrot.slane %v251_v8, %v267_v58 }
 0x18e   :  { %v306_v12 = vsel %vm305_vm5, %v288_v10, %v304_v9 }
 0x18f   :  { %v254_v13 = vpop.xlane.xlu1 %253  ;;  %v308_v15 = vsel %vm307_vm6, %v292_v11, %v306_v12 }
 0x190   :  { %v296_v14 = vrot.slane %v254_v13, %v267_v58 }
 0x192   :  { %v310_v16 = vsel %vm309_vm7, %v296_v14, %v308_v15 }
 0x193   :  { %312 = vxpose.xlu0.b32.start.end [1/1] (short) (narrow) %v310_v16, 8 }
 0x20f   :  { %v328_v17 = vpop.trf.xlu0 }
 0x210   :  { %v345_v18 = vsel %vm344_vm8, %v328_v17, -inf }
 0x211   :  { %346 = vmax.xlane.f32.xlu1 %v345_v18 }
 0x29a   :  { %v347_v19 = vpop.xlane.xlu1 %346 }
 0x29b   :  { %v348_v20 = vsub.f32 %v328_v17, %v347_v19 }
 0x29d   :  { %v349_v21 = vmul.f32 1.442695, %v348_v20 }
 0x29f   :  { %429 = vpow2.f32 %v349_v21 }
 0x2ac   :  { %v430_v22 = vpop.eup %429 }
 0x2ad   :  { %v351_v23 = vsel %vm344_vm8, %v430_v22, 0.0 }
 0x2ae   :  { %352 = vadd.xlane.f32.xlu1 %v351_v23 }
 0x337   :  { %v353_v24 = vpop.xlane.xlu1 %352 }
 0x338   :  { %431 = vrcp.f32 %v353_v24 }
 0x345   :  { %v432_v25 = vpop.eup %431 }
 0x346   :  { %v355_v26 = vmul.f32 %v432_v25, %v430_v22 }
 0x348   :  { %356 = vst.msk [vmem:[#allocation8] sm:$0xff] %vm344_vm8, %v355_v26 }
 0x349   :  { %504 = shalt.err (!%p501_p5)
}
 0x34a   :  { %366 = dma.vmem_to_hbm [thread:$0]  %s364_s5, 128, %s588_s4, [#allocation4]  }
 0x34b   :  { %517 = dma.done.wait [#allocation4], 128  }
 0x34c   :  { %518 = vsyncadd [#allocation4], 4294967168 }
 0x34d   :  { %370 = vsyncpa [#allocation3], 1 }
 0x34e   :  { %371 = vsyncpa [#allocation6], 1 }
 0x34f   :  { %372 = vsyncpa [#allocation4], 1 }

</bundles_post_ra>
